<compile_context>
chip_gen: v7x
topology: tpu7x:2x2x1
jax: 0.10.0
libtpu: 0.0.40
codegen_flags: <defaults>
</compile_context>

<pallas_src>
import jax
import jax.numpy as jnp
from jax.experimental import pallas as pl
from jax.experimental.pallas import tpu as pltpu


def relation_attention_kernel(
    p_ref, x_ref, maskb_ref,
    wp2_ref, wv_ref, bv_ref, wkg_ref,
    scal_ref,          # SMEM: [folded gate bias  (bg + bv.wgo)]
    out_ref,
):
    Bt, C, H = p_ref.shape
    L = x_ref.shape[1]

    p = p_ref[...]                                   # (Bt, C, H)
    x = x_ref[...]                                   # (Bt, L, H)
    mm_dtype = x.dtype                               # bf16 when compute_dtype=bf16

    # ---- x-side: the single remaining H x H projection (value), bias deferred
    v = jnp.dot(x.reshape(Bt * L, H), wv_ref[...],
                preferred_element_type=jnp.float32
                ).reshape(Bt, L, H).astype(mm_dtype)           # (Bt, L, H)

    # ---- x-side skinny rows, produced directly with L on the lane axis:
    #        row 0: folded key->score term   x @ (Wk^T wsk)
    #        row 1: folded value->gate term  x @ (Wv^T wgo)
    wkg_b = jnp.broadcast_to(wkg_ref[...], (Bt, 2, H)).astype(mm_dtype)
    kg = jnp.einsum('boh,blh->bol', wkg_b, x,
                    preferred_element_type=jnp.float32)        # (Bt, 2, L)
    kterm = kg[:, 0:1, :]                                      # (Bt, 1, L)
    gterm = kg[:, 1:2, :]                                      # (Bt, 1, L)

    # ---- p-side packed matvecs: col 0 = folded query->score, col 1 = gate p-term
    pa = jnp.dot(p.reshape(Bt * C, H), wp2_ref[...],
                 preferred_element_type=jnp.float32)           # (Bt*C, 2)
    a_score = pa[:, 0:1].reshape(Bt, C, 1)
    g_pterm = pa[:, 1:2].reshape(Bt, C, 1)

    # ---- additive score (+mask & score bias already folded into maskb), softmax
    score = a_score + kterm + maskb_ref[...]                   # (Bt, C, L) f32
    m = jnp.max(score, axis=-1, keepdims=True)
    e = jnp.exp(score - m)
    s = jnp.sum(e, axis=-1, keepdims=True)
    attn = e * pl.reciprocal(s, approx=True)                   # rows sum to 1 +- 2^-12

    # ---- attn-weighted value (+ bv once, since attn rows sum to ~1) + residual
    out = (jnp.einsum('bcl,bld->bcd', attn.astype(mm_dtype), v,
                      preferred_element_type=jnp.float32)
           + bv_ref[...] + p)                                  # (Bt, C, H) f32

    # ---- gate: VPU mul + lane reduce replaces the old out@wgo MXU matvec
    g_logit = jnp.sum(attn * gterm, axis=-1, keepdims=True) + g_pterm + scal_ref[0]
    g = jax.nn.sigmoid(g_logit)                                # (Bt, C, 1)

    out_ref[...] = (g * out + (1.0 - g) * p).astype(out_ref.dtype)


def relation_attention(p, x, kernel_params, mask=None, *,
                       block_b=None, compute_dtype=None):
    """compute_dtype=jnp.bfloat16 recommended at production sizes on v5e/v6e/v7x
    (MXU operands go bf16, accumulation and softmax/elementwise stay f32)."""
    B, C, H = p.shape
    _, L, _ = x.shape
    wp2, wv_t, bv_row, wkg, scalars = kernel_params
    out_dtype = p.dtype

    in_itemsize = (jnp.dtype(compute_dtype).itemsize
                   if compute_dtype is not None else p.dtype.itemsize)
    out_itemsize = out_dtype.itemsize

    # Single-buffer the H x H weight once it is big enough to matter (v7x: 64 MiB
    # physical VMEM); its block index never changes so Buffered(1) is free.
    big_weights = H * H * in_itemsize >= (4 << 20)

    def vmem_estimate(bb):
        f32 = 4
        io = 2 * bb * (C * H * in_itemsize        # p block (double-buffered)
                       + L * H * in_itemsize      # x block
                       + L * f32                  # mask/score-bias block
                       + C * H * out_itemsize)    # out block
        wbytes = (H * 2 + H * H + H + 2 * H) * in_itemsize + 4 * f32
        wfac = 1 if big_weights else 2
        tmp = bb * (L * H + 2 * L + 2 * C * L + C * H + 2 * C) * f32
        return io + wfac * wbytes + tmp * 3 // 2

    # Generation-aware VMEM budget (~48 MiB on v7x, ~96 MiB on v5e/v6e).
    try:
        vmem_phys = int(pltpu.get_tpu_info().vmem_capacity_bytes)
    except Exception:
        vmem_phys = 64 << 20
    budget = vmem_phys * 3 // 4

    if block_b is None:
        block_b = 1
        for bb in range(1, B + 1):
            if B % bb == 0 and vmem_estimate(bb) <= budget:
                block_b = bb
        # keep >= 2 grid steps when possible so both v7x TensorCores get work
        if B // block_b < 2:
            for bb in range(block_b - 1, 0, -1):
                if B % bb == 0 and B // bb >= 2:
                    block_b = bb
                    break
    assert B % block_b == 0
    grid = (B // block_b,)

    vmem_limit = int(min(budget, max(vmem_estimate(block_b) * 5 // 4, 32 << 20)))

    # mask -> additive bias; the fused score bias (bs_total) is folded in here so
    # the kernel does not read/broadcast it per step.
    bs_total = scalars[0]
    if mask is None:
        mask_bias = jnp.full((B, 1, L), bs_total, jnp.float32)
    else:
        mask_bias = ((1.0 - mask.astype(jnp.float32)) * (-1.0e9)
                     + bs_total).reshape(B, 1, L)
    gate_scal = scalars[1:2].astype(jnp.float32)               # SMEM (1,)

    if compute_dtype is not None:
        p_in = p.astype(compute_dtype)
        x_in = x.astype(compute_dtype)
        wp2_in = wp2.astype(compute_dtype)
        wv_in = wv_t.astype(compute_dtype)
        wkg_in = wkg.astype(compute_dtype)
    else:
        p_in, x_in, wp2_in, wv_in, wkg_in = p, x, wp2, wv_t, wkg
    # bv stays f32: it is added after the matmuls in f32.

    def batched(shape):
        return pl.BlockSpec(shape, lambda b: (b, 0, 0))

    if big_weights:
        def const2(shape):
            return pl.BlockSpec(shape, lambda b: (0, 0),
                                pipeline_mode=pl.Buffered(1))
    else:
        def const2(shape):
            return pl.BlockSpec(shape, lambda b: (0, 0))

    in_specs = [
        batched((block_b, C, H)),      # p
        batched((block_b, L, H)),      # x
        batched((block_b, 1, L)),      # additive mask + score bias
        const2((H, 2)),                # packed p-side matvecs [wqs | wgo+wgp]
        const2((H, H)),                # value weight (only H x H matmul left)
        const2((1, H)),                # value bias (added post attn@v)
        const2((2, H)),                # skinny x rows [key->score ; value->gate]
        pl.BlockSpec(memory_space=pltpu.MemorySpace.SMEM),   # [gate bias]
    ]
    out_spec = batched((block_b, C, H))

    return pl.pallas_call(
        relation_attention_kernel,
        out_shape=jax.ShapeDtypeStruct((B, C, H), out_dtype),
        grid_spec=pltpu.PrefetchScalarGridSpec(
            num_scalar_prefetch=0,
            grid=grid,
            in_specs=in_specs,
            out_specs=out_spec,
        ),
        compiler_params=pltpu.CompilerParams(
            dimension_semantics=("parallel",),
            vmem_limit_bytes=vmem_limit),
    )(p_in, x_in, mask_bias, wp2_in, wv_in, bv_row, wkg_in, gate_scal)


def init_torch_params(key, H):
    """Deterministic PyTorch-style Linear init (uniform +-1/sqrt(fan_in)),
    kept in PyTorch layouts (weight = (out_features, in_features))."""
    def linear(k, in_f, out_f):
        k1, k2 = jax.random.split(k)
        bound = 1.0 / (in_f ** 0.5)
        w = jax.random.uniform(k1, (out_f, in_f), jnp.float32, -bound, bound)
        b = jax.random.uniform(k2, (out_f,), jnp.float32, -bound, bound)
        return w, b

    kq, kk, kv, ks, kg = jax.random.split(key, 5)
    wq, bq = linear(kq, H, H)
    wk, bk = linear(kk, H, H)
    wv, bv = linear(kv, H, H)
    ws, bs = linear(ks, 2 * H, 1)
    wg, bg = linear(kg, 2 * H, 1)
    return dict(wq=wq, bq=bq, wk=wk, bk=bk, wv=wv, bv=bv,
                ws=ws, bs=bs, wg=wg, bg=bg)


def fuse_params(raw):
    """Exact host-side algebra: fold query/key into the score weights, fold the
    gate's out-half through the value projection, pack skinny operands."""
    H = raw['wq'].shape[0]
    wsq = raw['ws'][:, :H].T          # (H, 1)
    wsk = raw['ws'][:, H:].T          # (H, 1)
    wgo = raw['wg'][:, :H].T          # (H, 1)
    wgp = raw['wg'][:, H:].T          # (H, 1)

    # score(cat[q,k]) = p@(Wq^T wsq) + x@(Wk^T wsk) + (bs + bq.wsq + bk.wsk)
    wqs = raw['wq'].T @ wsq                                # (H, 1)
    wks = raw['wk'].T @ wsk                                # (H, 1)
    bs_total = raw['bs'][0] + raw['bq'] @ wsq[:, 0] + raw['bk'] @ wsk[:, 0]

    # gate(cat[out,p]) = attn@(x@(Wv^T wgo)) + p@(wgo+wgp) + (bg + bv.wgo)
    wvg = raw['wv'].T @ wgo                                # (H, 1)
    gate_bias = raw['bg'][0] + raw['bv'] @ wgo[:, 0]

    wp2 = jnp.concatenate([wqs, wgo + wgp], axis=1)        # (H, 2)
    wkg = jnp.concatenate([wks, wvg], axis=1).T            # (2, H)
    wv_t = raw['wv'].T                                     # (H, H)
    bv_row = raw['bv'].reshape(1, H)                       # (1, H)
    scalars = jnp.stack([bs_total, gate_bias]).astype(jnp.float32)  # (2,)

    return wp2, wv_t, bv_row, wkg, scalars


def reference(p, x, raw, mask=None):
    """Pure-JAX reference following the PyTorch forward exactly (unfused)."""
    H = p.shape[-1]
    q = p @ raw['wq'].T + raw['bq']
    k = x @ raw['wk'].T + raw['bk']
    v = x @ raw['wv'].T + raw['bv']
    score = (q @ raw['ws'][:, :H].T
             + jnp.swapaxes(k @ raw['ws'][:, H:].T, 1, 2)
             + raw['bs'][0])                               # (B, C, L)
    if mask is not None:
        score = jnp.where(mask[:, None, :] == 0, -1.0e9, score)
    attn = jax.nn.softmax(score, axis=2)
    out = jnp.einsum('bcl,bld->bcd', attn, v) + p
    g = jax.nn.sigmoid(out @ raw['wg'][:, :H].T
                       + p @ raw['wg'][:, H:].T + raw['bg'][0])
    return g * out + (1.0 - g) * p


if __name__ == "__main__":
    key = jax.random.PRNGKey(0)
    B, C, L, H = 4, 8, 16, 32
    kp, kx, km, kparam = jax.random.split(key, 4)

    p = jax.random.normal(kp, (B, C, H), jnp.float32)
    x = jax.random.normal(kx, (B, L, H), jnp.float32)
    mask = (jax.random.uniform(km, (B, L)) > 0.25).astype(jnp.float32)

    raw = init_torch_params(kparam, H)
    kparams = fuse_params(raw)
    ref = reference(p, x, raw, mask=mask)

    # f32 path (tight check; approx-reciprocal softmax is the only deviation).
    out = relation_attention(p, x, kparams, mask=mask)
    out = jax.block_until_ready(out)
    assert out.shape == (B, C, H)
    err = float(jnp.max(jnp.abs(out - ref)))
    assert jnp.allclose(out, ref, atol=3e-3, rtol=3e-3), err

    # bf16 MXU-operand path (production setting on v5e/v6e/v7x); f32 accumulate
    # and f32 softmax/elementwise, so only bf16 rounding of the matmul operands.
    out_bf16 = relation_attention(p, x, kparams, mask=mask,
                                  compute_dtype=jnp.bfloat16)
    out_bf16 = jax.block_until_ready(out_bf16)
    err_bf16 = float(jnp.max(jnp.abs(out_bf16 - ref)))
    assert jnp.allclose(out_bf16, ref, atol=1e-1, rtol=1e-1), err_bf16

    print("KERNEL_OK")
</pallas_src>

<mosaic_0001>
module attributes {stable_mosaic.version = 11 : i64} {
  func.func @relation_attention_kernel(%arg0: i32, %arg1: memref<2x8x32xf32, #tpu.memory_space<vmem>>, %arg2: memref<2x16x32xf32, #tpu.memory_space<vmem>>, %arg3: memref<2x1x16xf32, #tpu.memory_space<vmem>>, %arg4: memref<32x2xf32, #tpu.memory_space<vmem>>, %arg5: memref<32x32xf32, #tpu.memory_space<vmem>>, %arg6: memref<1x32xf32, #tpu.memory_space<vmem>>, %arg7: memref<2x32xf32, #tpu.memory_space<vmem>>, %arg8: memref<1xf32, #tpu.memory_space<smem>>, %arg9: memref<2x8x32xf32, #tpu.memory_space<vmem>>) attributes {dimension_semantics = [#tpu.dimension_semantics<parallel>], iteration_bounds = array<i64: 2>, scalar_prefetch = 0 : i64, scratch_operands = 0 : i64, tpu.core_type = #tpu.core_type<tc>, window_params = [{transform_indices = @transform_0, window_bounds = array<i64: 2, 8, 32>}, {transform_indices = @transform_1, window_bounds = array<i64: 2, 16, 32>}, {transform_indices = @transform_2, window_bounds = array<i64: 2, 1, 16>}, {pipeline_mode = #tpu.pipeline_mode<synchronous>, transform_indices = @transform_3, window_bounds = array<i64: 32, 2>}, {pipeline_mode = #tpu.pipeline_mode<synchronous>, transform_indices = @transform_4, window_bounds = array<i64: 32, 32>}, {pipeline_mode = #tpu.pipeline_mode<synchronous>, transform_indices = @transform_5, window_bounds = array<i64: 1, 32>}, {pipeline_mode = #tpu.pipeline_mode<synchronous>, transform_indices = @transform_6, window_bounds = array<i64: 2, 32>}, {transform_indices = @transform_7, window_bounds = array<i64: 1>}, {transform_indices = @transform_8, window_bounds = array<i64: 2, 8, 32>}]} {
    %c0 = arith.constant 0 : index
    %c0_0 = arith.constant 0 : index
    %c0_1 = arith.constant 0 : index
    %0 = vector.load %arg1[%c0, %c0_0, %c0_1] : memref<2x8x32xf32, #tpu.memory_space<vmem>>, vector<2x8x32xf32>
    %c0_2 = arith.constant 0 : index
    %c0_3 = arith.constant 0 : index
    %c0_4 = arith.constant 0 : index
    %1 = vector.load %arg2[%c0_2, %c0_3, %c0_4] : memref<2x16x32xf32, #tpu.memory_space<vmem>>, vector<2x16x32xf32>
    %2 = vector.shape_cast %1 : vector<2x16x32xf32> to vector<32x32xf32>
    %c0_5 = arith.constant 0 : index
    %c0_6 = arith.constant 0 : index
    %3 = vector.load %arg5[%c0_5, %c0_6] : memref<32x32xf32, #tpu.memory_space<vmem>>, vector<32x32xf32>
    %cst = arith.constant dense<0.000000e+00> : vector<32x32xf32>
    %4 = tpu.matmul %2, %3, %cst {dimension_numbers = #tpu.dot_dimension_numbers<[1], [0], [0], [1], [0, 0, 1, 1], [], []>} : vector<32x32xf32>, vector<32x32xf32>, vector<32x32xf32> -> vector<32x32xf32>
    %5 = vector.shape_cast %4 : vector<32x32xf32> to vector<2x16x32xf32>
    %c0_7 = arith.constant 0 : index
    %c0_8 = arith.constant 0 : index
    %6 = vector.load %arg7[%c0_7, %c0_8] : memref<2x32xf32, #tpu.memory_space<vmem>>, vector<2x32xf32>
    %7 = vector.shape_cast %6 : vector<2x32xf32> to vector<1x2x32xf32>
    %8 = vector.broadcast %7 : vector<1x2x32xf32> to vector<2x2x32xf32>
    "tpu.trace_start"() <{level = 10 : i32, message = "boh,blh->bol"}> : () -> ()
    %cst_9 = arith.constant dense<0.000000e+00> : vector<2x2x16xf32>
    %9 = tpu.matmul %8, %1, %cst_9 {dimension_numbers = #tpu.dot_dimension_numbers<[2], [2], [1], [1], [0, 0, 0, 1, 1, 1], [0], [0]>} : vector<2x2x32xf32>, vector<2x16x32xf32>, vector<2x2x16xf32> -> vector<2x2x16xf32>
    "tpu.trace_stop"() : () -> ()
    %10 = vector.extract_strided_slice %9 {offsets = [0, 0, 0], sizes = [2, 1, 16], strides = [1, 1, 1]} : vector<2x2x16xf32> to vector<2x1x16xf32>
    %11 = vector.extract_strided_slice %9 {offsets = [0, 1, 0], sizes = [2, 1, 16], strides = [1, 1, 1]} : vector<2x2x16xf32> to vector<2x1x16xf32>
    %12 = vector.shape_cast %0 : vector<2x8x32xf32> to vector<16x32xf32>
    %c0_10 = arith.constant 0 : index
    %c0_11 = arith.constant 0 : index
    %13 = vector.load %arg4[%c0_10, %c0_11] : memref<32x2xf32, #tpu.memory_space<vmem>>, vector<32x2xf32>
    %cst_12 = arith.constant dense<0.000000e+00> : vector<16x2xf32>
    %14 = tpu.matmul %12, %13, %cst_12 {dimension_numbers = #tpu.dot_dimension_numbers<[1], [0], [0], [1], [0, 0, 1, 1], [], []>} : vector<16x32xf32>, vector<32x2xf32>, vector<16x2xf32> -> vector<16x2xf32>
    %15 = vector.extract_strided_slice %14 {offsets = [0, 0], sizes = [16, 1], strides = [1, 1]} : vector<16x2xf32> to vector<16x1xf32>
    %16 = vector.shape_cast %15 : vector<16x1xf32> to vector<2x8x1xf32>
    %17 = vector.extract_strided_slice %14 {offsets = [0, 1], sizes = [16, 1], strides = [1, 1]} : vector<16x2xf32> to vector<16x1xf32>
    %18 = vector.shape_cast %17 : vector<16x1xf32> to vector<2x8x1xf32>
    %19 = vector.broadcast %16 : vector<2x8x1xf32> to vector<2x8x16xf32>
    %20 = vector.broadcast %10 : vector<2x1x16xf32> to vector<2x8x16xf32>
    %21 = arith.addf %19, %20 : vector<2x8x16xf32>
    %c0_13 = arith.constant 0 : index
    %c0_14 = arith.constant 0 : index
    %c0_15 = arith.constant 0 : index
    %22 = vector.load %arg3[%c0_13, %c0_14, %c0_15] : memref<2x1x16xf32, #tpu.memory_space<vmem>>, vector<2x1x16xf32>
    %23 = vector.broadcast %22 : vector<2x1x16xf32> to vector<2x8x16xf32>
    %24 = arith.addf %21, %23 : vector<2x8x16xf32>
    %cst_16 = arith.constant dense<0xFF800000> : vector<2x8xf32>
    %25 = vector.multi_reduction <maximumf>, %24, %cst_16 [2] : vector<2x8x16xf32> to vector<2x8xf32>
    %26 = vector.shape_cast %25 : vector<2x8xf32> to vector<2x8x1xf32>
    %27 = vector.broadcast %26 : vector<2x8x1xf32> to vector<2x8x16xf32>
    %28 = arith.subf %24, %27 : vector<2x8x16xf32>
    %29 = math.exp %28 : vector<2x8x16xf32>
    %cst_17 = arith.constant dense<0.000000e+00> : vector<2x8xf32>
    %30 = vector.multi_reduction <add>, %29, %cst_17 [2] : vector<2x8x16xf32> to vector<2x8xf32>
    %31 = vector.shape_cast %30 : vector<2x8xf32> to vector<2x8x1xf32>
    %32 = tpu.reciprocal %31 {approx = true} : vector<2x8x1xf32> -> vector<2x8x1xf32>
    %33 = vector.broadcast %32 : vector<2x8x1xf32> to vector<2x8x16xf32>
    %34 = arith.mulf %29, %33 : vector<2x8x16xf32>
    "tpu.trace_start"() <{level = 10 : i32, message = "bcl,bld->bcd"}> : () -> ()
    %cst_18 = arith.constant dense<0.000000e+00> : vector<2x8x32xf32>
    %35 = tpu.matmul %34, %5, %cst_18 {dimension_numbers = #tpu.dot_dimension_numbers<[2], [1], [1], [2], [0, 0, 0, 1, 1, 2], [0], [0]>} : vector<2x8x16xf32>, vector<2x16x32xf32>, vector<2x8x32xf32> -> vector<2x8x32xf32>
    "tpu.trace_stop"() : () -> ()
    %c0_19 = arith.constant 0 : index
    %c0_20 = arith.constant 0 : index
    %36 = vector.load %arg6[%c0_19, %c0_20] : memref<1x32xf32, #tpu.memory_space<vmem>>, vector<1x32xf32>
    %37 = vector.shape_cast %36 : vector<1x32xf32> to vector<1x1x32xf32>
    %38 = vector.broadcast %37 : vector<1x1x32xf32> to vector<2x8x32xf32>
    %39 = arith.addf %35, %38 : vector<2x8x32xf32>
    %40 = arith.addf %39, %0 : vector<2x8x32xf32>
    %41 = vector.broadcast %11 : vector<2x1x16xf32> to vector<2x8x16xf32>
    %42 = arith.mulf %34, %41 : vector<2x8x16xf32>
    %cst_21 = arith.constant dense<0.000000e+00> : vector<2x8xf32>
    %43 = vector.multi_reduction <add>, %42, %cst_21 [2] : vector<2x8x16xf32> to vector<2x8xf32>
    %44 = vector.shape_cast %43 : vector<2x8xf32> to vector<2x8x1xf32>
    %45 = arith.addf %44, %18 : vector<2x8x1xf32>
    %c0_22 = arith.constant 0 : index
    %46 = memref.load %arg8[%c0_22] : memref<1xf32, #tpu.memory_space<smem>>
    %47 = vector.broadcast %46 : f32 to vector<2x8x1xf32>
    %48 = arith.addf %45, %47 : vector<2x8x1xf32>
    %49 = arith.negf %48 : vector<2x8x1xf32>
    %50 = math.exp %49 : vector<2x8x1xf32>
    %cst_23 = arith.constant 1.000000e+00 : f32
    %51 = vector.broadcast %cst_23 : f32 to vector<2x8x1xf32>
    %52 = arith.addf %51, %50 : vector<2x8x1xf32>
    %53 = arith.divf %51, %52 : vector<2x8x1xf32>
    %54 = vector.broadcast %53 : vector<2x8x1xf32> to vector<2x8x32xf32>
    %55 = arith.mulf %54, %40 : vector<2x8x32xf32>
    %cst_24 = arith.constant 1.000000e+00 : f32
    %56 = vector.broadcast %cst_24 : f32 to vector<2x8x1xf32>
    %57 = arith.subf %56, %53 : vector<2x8x1xf32>
    %58 = vector.broadcast %57 : vector<2x8x1xf32> to vector<2x8x32xf32>
    %59 = arith.mulf %58, %0 : vector<2x8x32xf32>
    %60 = arith.addf %55, %59 : vector<2x8x32xf32>
    %c0_25 = arith.constant 0 : index
    %c0_26 = arith.constant 0 : index
    %c0_27 = arith.constant 0 : index
    %61 = vector.load %arg9[%c0_25, %c0_26, %c0_27] : memref<2x8x32xf32, #tpu.memory_space<vmem>>, vector<2x8x32xf32>
    tpu.vector_store %arg9[%c0_25, %c0_26, %c0_27], %60 {strides = array<i32>} : memref<2x8x32xf32, #tpu.memory_space<vmem>>, vector<2x8x32xf32>,
    return
  }
  func.func @transform_0(%arg0: i32) -> (i32, i32, i32) {
    %c0_i32 = arith.constant 0 : i32
    %c0_i32_0 = arith.constant 0 : i32
    %c0_i32_1 = arith.constant 0 : i32
    return %arg0, %c0_i32, %c0_i32_0 : i32, i32, i32
  }
  func.func @transform_1(%arg0: i32) -> (i32, i32, i32) {
    %c0_i32 = arith.constant 0 : i32
    %c0_i32_0 = arith.constant 0 : i32
    %c0_i32_1 = arith.constant 0 : i32
    return %arg0, %c0_i32, %c0_i32_0 : i32, i32, i32
  }
  func.func @transform_2(%arg0: i32) -> (i32, i32, i32) {
    %c0_i32 = arith.constant 0 : i32
    %c0_i32_0 = arith.constant 0 : i32
    %c0_i32_1 = arith.constant 0 : i32
    return %arg0, %c0_i32, %c0_i32_0 : i32, i32, i32
  }
  func.func @transform_3(%arg0: i32) -> (i32, i32) {
    %c0_i32 = arith.constant 0 : i32
    %c0_i32_0 = arith.constant 0 : i32
    %c0_i32_1 = arith.constant 0 : i32
    return %c0_i32, %c0_i32_0 : i32, i32
  }
  func.func @transform_4(%arg0: i32) -> (i32, i32) {
    %c0_i32 = arith.constant 0 : i32
    %c0_i32_0 = arith.constant 0 : i32
    %c0_i32_1 = arith.constant 0 : i32
    return %c0_i32, %c0_i32_0 : i32, i32
  }
  func.func @transform_5(%arg0: i32) -> (i32, i32) {
    %c0_i32 = arith.constant 0 : i32
    %c0_i32_0 = arith.constant 0 : i32
    %c0_i32_1 = arith.constant 0 : i32
    return %c0_i32, %c0_i32_0 : i32, i32
  }
  func.func @transform_6(%arg0: i32) -> (i32, i32) {
    %c0_i32 = arith.constant 0 : i32
    %c0_i32_0 = arith.constant 0 : i32
    %c0_i32_1 = arith.constant 0 : i32
    return %c0_i32, %c0_i32_0 : i32, i32
  }
  func.func @transform_7(%arg0: i32) -> i32 {
    %c0_i32 = arith.constant 0 : i32
    %c0_i32_0 = arith.constant 0 : i32
    return %c0_i32 : i32
  }
  func.func @transform_8(%arg0: i32) -> (i32, i32, i32) {
    %c0_i32 = arith.constant 0 : i32
    %c0_i32_0 = arith.constant 0 : i32
    %c0_i32_1 = arith.constant 0 : i32
    return %arg0, %c0_i32, %c0_i32_0 : i32, i32, i32
  }
}

</mosaic_0001>

<bundles_post_ra>
// kernel: tpu_custom_call.1
= control target key start
LH: loop header
LB: loop body
LE: loop exit
PB: predicated region body
PF: predicated region fallthrough
CT: control target
= control target key end

     0   :  { %s1836_s0 = inlined_call_operand.vmem [shape: f32[4,8,32], index: 0, kind: input, shape index: {}]   ;;  %s1837_s1 = inlined_call_operand.hbm [shape: f32[4,16,32], index: 1, kind: input, shape index: {}]   ;;  %s1838_s2 = inlined_call_operand.vmem [shape: f32[4,1,16], index: 2, kind: input, shape index: {}]   ;;  %s1839_s3 = inlined_call_operand.vmem [shape: f32[32,2], index: 3, kind: input, shape index: {}]   ;;  %s1840_s4 = inlined_call_operand.hbm [shape: f32[32,32], index: 4, kind: input, shape index: {}]   ;;  %s1841_s5 = inlined_call_operand.vmem [shape: f32[1,32], index: 5, kind: input, shape index: {}]   ;;  %s1842_s6 = inlined_call_operand.vmem [shape: f32[2,32], index: 6, kind: input, shape index: {}]   ;;  %s1843_s7 = inlined_call_operand.<no memory space> [shape: f32[1], index: 7, kind: input, shape index: {}]   ;;  %s1844_s8 = inlined_call_operand.hbm [shape: f32[4,8,32], index: 8, kind: output, shape index: {}]  }
   0x1   :  { %13 = sst [smem:[#allocation2]] %s1843_s7 }
   0x2   :  { %14 = vsyncpa [#allocation4], 0 }
   0x3   :  { %16 = vsyncpa [#allocation4 + $0x1], 0 }
   0x4   :  { %17 = vsyncpa [#allocation7], 0 }
   0x5   :  { %18 = vsyncpa [#allocation5], 0 }
   0x6   :  { %20 = vsyncpa [#allocation5 + $0x1], 0  ;;  %s1543_s29 = smov 0   ;;  %s1545_s30 = smov 0  }
   0x7   :  { %s1547_s9 = smov 0   ;;  %s1549_s10 = smov 0  }
   0x8 LB: > { %s1564_s7 = sadd.s32 4294967295, %s1481_s10   ;;  %s1117_s11 = sadd.s32 4294967294, %s1481_s10   ;;  %s1481_s10 = sphi %s1549_s10, %s1868_s10   ;;  %s1477_s9 = sphi %s1547_s9, %s1867_s9   ;;  %s1473_s30 = sphi %s1545_s30, %s1866_s30   ;;  %s1469_s29 = sphi %s1543_s29, %s1865_s29  }
   0x9   : > { %p72_p0 = scmp.ne.s32.totalorder %s1473_s30, %s1469_s29  ;;  %p1845_p1 = scmp.eq.s32.totalorder %s1564_s7, 0 }
   0xa   : > { %p233_p3 = scmp.eq.s32.totalorder %s1117_s11, 1  ;;  %p1118_p5 = scmp.ge.s32.totalorder %s1481_s10, 1 }
   0xb   : > { %p1573_p4 = por %p1845_p1, %p72_p0  ;;  %p240_p7 = scmp.lt.s32.totalorder %s1481_s10, 3 }
   0xc   : > { %p1578_p6 = por %p233_p3, %p72_p0  ;;  %s1483_s15 = smov [#allocation6]  }
   0xd   : > { %s1849_s12 = scalar_select %p1573_p4, 1, 0 }
   0xe   : > { %s1850_s13 = scalar_select %p1578_p6, 1, 0 }
   0xf   : > { %p1583_p8 = pnand %p1118_p5, %p240_p7  ;;  %s255_s16 = sshll.u32 %s1483_s15, 4  ;;  %s1587_s16 = int_to_ptr.vmem [resolvable:$true] %s255_s16 }
  0x10   : > { %s1599_s18 = sadd.s32 1, %s1481_s10   ;;  %s59_s19 = sadd.s32 1, %s1477_s9 }
  0x11   : > { %s1851_s14 = scalar_select %p1583_p8, 1, 0 }
  0x12   : > { %p1276_p9 = pneg %p1583_p8  ;;  %s56_s20 = ssub.s32 %s1481_s10, %s1599_s18 }
  0x13   : > { %s1353_s23 = scalar_lea.hbm %s1840_s4, 512 }
  0x14   : > { %p1594_p11 = pnand %p1276_p9, %p1845_p1  ;;  %p1354_p12 = scmp.ne.s32.totalorder %s1840_s4, %s1353_s23 }
  0x15   : > { %p1360_p5 = scmp.lt.u32.totalorder %s1353_s23, %s1840_s4 }
  0x16   : > { %p1355_p13 = pneg %p1594_p11 }
  0x18   : > { %p1356_p0 = pnand %p1355_p13, %p1354_p12 }
  0x1a   : > { %p1357_p3 = pneg %p1356_p0 }
  0x1c   : > { %p1362_p7 = pnand %p1360_p5, %p1357_p3 }
  0x1e   : > { %1365 = shalt.err (!%p1362_p7)
}
  0x1f   : > { %s1366_s28 = scalar_lea.vmem %s1587_s16, 512  ;;  %p1374_p2 = scmp.lt.s32.totalorder %s1587_s16, %s1587_s16 }
  0x20   : > { %p1367_p9 = scmp.ne.s32.totalorder %s1587_s16, %s1366_s28  ;;  %p1375_p6 = scmp.lt.s32.totalorder %s1366_s28, %s1366_s28 }
  0x22   : > { %p1369_p10 = pnand %p1367_p9, %p1355_p13  ;;  %p1376_p4 = por %p1375_p6, %p1374_p2 }
  0x24   : > { %p1370_p1 = pneg %p1369_p10 }
  0x26   : > { %p1377_p8 = pnand %p1376_p4, %p1370_p1 }
  0x28   : > { %1380 = shalt.err (!%p1377_p8)
}
  0x29   : > { %s1848_s11 = smov 128   ;;  %s1485_s15 = smov 8  }
  0x2a   : > { %1279 = dma.hbm_to_vmem [thread:$0]  (!%p1594_p11), %s1840_s4, 512, %s1587_s16, [#allocation7], %s1848_s11, %s1848_s11, %s1485_s15  }
  0x2b   : > { %p57_p1 = scmp.eq.s32.totalorder %s56_s20, 0  ;;  %p66_p2 = scmp.ne.s32.totalorder %s1477_s9, %s1473_s30 }
  0x2c   : > { %p67_p4 = scmp.eq.s32.totalorder %s1481_s10, 0  ;;  %p1289_p6 = scmp.lt.s32.totalorder %s1481_s10, 2 }
  0x2d   : > { %s1633_s23 = scalar_select %p57_p1, %s1477_s9, %s59_s19  }
  0x2e   : > { %p68_p8 = por %p67_p4, %p66_p2  ;;  %p1853_p10 = scmp.eq.s32.totalorder %s1564_s7, 1 }
  0x2f   : > { %s287_s17 = sand.u32 1, %s1477_s9   ;;  %s1157_s25 = sshll.u32 %s1481_s10, 9 }
  0x30   : > { %p1637_p12 = por %p1853_p10, %p66_p2  ;;  %s1121_s26 = sshll.u32 %s287_s17, 5 }
  0x31   : > { %s1646_s21 = scalar_lea.hbm %s1837_s1, %s1157_s25  ;;  %s291_s16 = scalar_lea.vmem [#allocation3], %s1121_s26 }
  0x32   : > { %s299_s19 = sshll.u32 %s291_s16, 4  ;;  %p1648_p11 = pnand %p1289_p6, %p68_p8  ;;  %s1652_s19 = int_to_ptr.vmem [resolvable:$true] %s299_s19 }
  0x33   : > { %s1654_s22 = scalar_lea.sflag [#allocation4], %s287_s17  ;;  %s1381_s11 = scalar_lea.hbm %s1646_s21, 512 }
  0x34   : > { %p1382_p13 = scmp.ne.s32.totalorder %s1646_s21, %s1381_s11  ;;  %p1383_p0 = pneg %p1648_p11 }
  0x35   : > { %s1386_s27 = scalar_lea.hbm %s1837_s1, 1024  ;;  %p1387_p7 = scmp.lt.u32.totalorder %s1646_s21, %s1837_s1 }
  0x36   : > { %p1384_p3 = pnand %p1383_p0, %p1382_p13  ;;  %p1388_p9 = scmp.lt.u32.totalorder %s1386_s27, %s1381_s11 }
  0x37   : > { %p1390_p2 = scmp.lt.u32.totalorder %s1381_s11, %s1646_s21 }
  0x38   : > { %p1385_p5 = pneg %p1384_p3  ;;  %p1389_p1 = por %p1388_p9, %p1387_p7 }
  0x3a   : > { %p1391_p4 = por %p1390_p2, %p1389_p1 }
  0x3c   : > { %p1392_p6 = pnand %p1391_p4, %p1385_p5 }
  0x3e   : > { %1395 = shalt.err (!%p1392_p6)
}
  0x3f   : > { %s1396_s17 = scalar_lea.vmem %s1652_s19, 512  ;;  %s1486_s25 = smov [#allocation3]  }
  0x40   : > { %p1397_p8 = scmp.ne.s32.totalorder %s1652_s19, %s1396_s17  ;;  %s1401_s26 = sshll.u32 %s1486_s25, 4  ;;  %s1402_s26 = int_to_ptr.vmem [resolvable:$false] %s1401_s26 }
  0x41   : > { %s1403_s28 = scalar_lea.vmem %s1402_s26, 1024  ;;  %p1404_p3 = scmp.lt.s32.totalorder %s1652_s19, %s1402_s26 }
  0x42   : > { %p1399_p10 = pnand %p1397_p8, %p1383_p0  ;;  %p1405_p7 = scmp.lt.s32.totalorder %s1403_s28, %s1396_s17 }
  0x44   : > { %p1400_p13 = pneg %p1399_p10  ;;  %p1406_p9 = por %p1405_p7, %p1404_p3 }
  0x46   : > { %p1407_p1 = pnand %p1406_p9, %p1400_p13 }
  0x48   : > { %1410 = shalt.err (!%p1407_p1)
}
  0x49   : > { %s1856_s11 = smov 128   ;;  %p1857_p0 = scmp.ne.s32.totalorder %s1851_s14, 0 }
  0x4a   : > { %1283 = dma.hbm_to_vmem [thread:$0]  (!%p1648_p11), %s1646_s21, 512, %s1652_s19, %s1654_s22, %s1856_s11, %s1856_s11, %s1485_s15  }
  0x4b   : > { %319 = sbr.rel (%p1857_p0) target bundleno = 1098 (0x44a), region = 52  ;;  %s1688_s27 = sand.u32 (!%p1857_p0), 1, %s1473_s30  }
  0x4c   : > { %s1126_s16 = sshll.u32 (!%p1857_p0), %s1688_s27, 5  ;;  %s322_s17 = scalar_lea.sflag (!%p1857_p0), [#allocation4], %s1688_s27 }
  0x4d   : > { %s1692_s25 = scalar_lea.vmem (!%p1857_p0), [#allocation3], %s1126_s16  ;;  %p1858_p5 = scmp.ne.s32.totalorder (!%p1857_p0), %s1849_s12, 0 }
  0x52   : > { %1456 = dma.done.wait (%p1858_p5), %s322_s17, 512  }
  0x53   : > { %1458 = vsyncadd (%p1858_p5), %s322_s17, 4294966784  ;;  %p1859_p11 = scmp.eq.s32.totalorder %s1564_s7, 0 }
  0x55   : > { %1460 = dma.done.wait (%p1859_p11), [#allocation7], 512   ;;  %p1860_p2 = pmov %p1859_p11 }
  0x56   : > { %v1487_v0 = vmov 0.0|0.0   ;;  %vm1488_vm0 = vmmov 0   ;;  %v1489_v1 = vmov 0.0   ;;  %s1129_s14 = sshll.u32 %s1564_s7, 1  ;;  %vm394_vm1 = vcmask 261120   ;;  %v386_v2 = vld [vmem:[%s1692_s25] sm:$0xff] }
  0x57   : > { %1462 = vsyncadd (%p1860_p2), [#allocation7], 4294966784  ;;  %1246 = vmatprep.subr.bf16.mxu1 %v1487_v0  ;;  %1203 = vmatprep.mubr.msk.f32.mxu1 %vm1488_vm0, %v1489_v1  ;;  %p372_p4 = scmp.lt.s32.totalorder %s1129_s14, 3  ;;  %v387_v3 = vld [vmem:[%s1692_s25 + $0x8] sm:$0xff]  ;;  %v636_v6 = vld [vmem:[%s1839_s3] sm:$0xff]  ;;  %v1490_v24 = vmov 0   ;;  %v731_v25 = vlaneseq }
  0x58   : > { %vm1710_vm2 = vmpackc.low %vm394_vm1, %vm394_vm1  ;;  %v1247_v5 = vpack.c.bf16 %v387_v3, %v386_v2  ;;  %v637_v7 = vld [vmem:[%s1839_s3 + $0x8] sm:$0xff]  ;;  %1193 = vmatprep.mubr.msk.f32.mxu0 %vm394_vm1, %v386_v2  ;;  %v390_v9 = vld [vmem:[#allocation6] sm:$0xff]  ;;  %1334 = vset.pattern.permute.xlu0 %v1490_v24  ;;  %vm757_vm3 = vcmask 130048   ;;  %s1128_s28 = sshll.u32 %s1688_s27, 4  ;;  %s1158_s11 = sshll.u32 %s1564_s7, 8 }
  0x59   : > { %s1870_s14 = smov (!%p372_p4, %s1129_s14), 3  ;;  %v1254_v8 = vpack.c.bf16 %v637_v7, %v636_v6  ;;  %v391_v10 = vld [vmem:[#allocation6 + $0x8] sm:$0xff]  ;;  %v392_v11 = vld [vmem:[#allocation6 + $0x10] sm:$0xff]  ;;  %v393_v13 = vld [vmem:[#allocation6 + $0x18] sm:$0xff]  ;;  %v732_v26 = vshrl.u32 %v731_v25, 7  ;;  %s370_s16 = scalar_lea.vmem [#allocation8], %s1128_s28 }
  0x5a   : > { %s1130_s20 = sshll.u32 %s1870_s14, 3  ;;  %1249 = vmatpush3.bf16.xpose.msk.msra.mxu1 %vm1710_vm2, %v1247_v5  ;;  %v1238_v12 = vpack.c.bf16 %v391_v10, %v390_v9  ;;  %v638_v14 = vld [vmem:[%s1839_s3 + $0x10] sm:$0xff]  ;;  %v639_v15 = vld [vmem:[%s1839_s3 + $0x18] sm:$0xff]  ;;  %v1242_v16 = vpack.c.bf16 %v393_v13, %v392_v11  ;;  %v492_v17 = vld [vmem:[%s1842_s6] sm:$0x3]  ;;  %v1491_v11 = vmov 1   ;;  %s1789_s21 = scalar_lea.hbm %s1844_s8, %s1158_s11 }
  0x5b   : > { %1255 = vmatprep.subr.bf16.mxu1 %v1254_v8  ;;  %s375_s12 = scalar_lea.vmem %s1836_s0, %s1130_s20  ;;  %v1258_v18 = vpack.c.bf16 %v639_v15, %v638_v14  ;;  %v388_v20 = vld [vmem:[%s1692_s25 + $0x10] sm:$0xff]  ;;  %v389_v21 = vld [vmem:[%s1692_s25 + $0x18] sm:$0xff]  ;;  %v937_v27 = vsub.s32 1, %v732_v26  ;;  %v733_v42 = vsub.s32 0, %v732_v26  ;;  %s381_s20 = scalar_lea.vmem %s1838_s2, %s1870_s14  ;;  %1335 = vset.pattern.permute.xlu1 %v1491_v11 }
  0x5c   : > { %1239 = vmatprep.subr.bf16.mxu0 %v1238_v12  ;;  %v1736_v19 = vld [vmem:[%s375_s12] sm:$0xff]  ;;  %v1743_v22 = vld [vmem:[%s375_s12 + $0x8] sm:$0xff]  ;;  %v1251_v23 = vpack.c.bf16 %v389_v21, %v388_v20  ;;  %s953_s14 = sld [smem:[#allocation2]]  ;;  %s1013_s17 = sshll.u32 %s370_s16, 4  ;;  %s1791_s17 = int_to_ptr.vmem [resolvable:$true] %s1013_s17 }
  0x5d   : > { %1241 = vmatpush3.bf16.msra.mxu0 %v1238_v12  ;;  %v1144_v45 = vld [vmem:[%s381_s20] ss:$0 sm:$0xff]  ;;  %v1145_v50 = vld [vmem:[%s381_s20 + $0x1] ss:$0 sm:$0xff]  ;;  %s1000_s7 = scalar_lea.sflag [#allocation5], %s1688_s27  ;;  %s1411_s25 = scalar_lea.vmem %s1791_s17, 256 }
  0x5e   : > { %1243 = vmatprep.subr.bf16.mxu0 %v1242_v16  ;;  %p1412_p6 = scmp.ne.s32.totalorder %s1791_s17, %s1411_s25  ;;  %s1492_s19 = smov [#allocation8]  }
  0x5f   : > { %s1415_s20 = sshll.u32 %s1492_s19, 4  ;;  %s1416_s20 = int_to_ptr.vmem [resolvable:$false] %s1415_s20 }
  0x60   : > { %p1413_p8 = pnand %p1412_p6, %p1637_p12  ;;  %p1418_p13 = scmp.lt.s32.totalorder %s1791_s17, %s1416_s20 }
  0x61   : > { %1204 = vmatmul.mubr.msk.f32.vlgmr.msra.gmra.mrb[0].mxu1 %vm394_vm1, %v492_v17  ;;  %1245 = vmatpush3.bf16.msra.mxu0 %v1242_v16 }
  0x62   : > { %1257 = vmatpush3.bf16.msra.mxu1 %v1254_v8  ;;  %1221 = vmatprep.mubr.msk.f32.mxu1 %vm394_vm1, %v1736_v19  ;;  %v954_v12 = vstv %s953_s14  ;;  %p1414_p10 = pneg %p1413_p8  ;;  %s1417_s14 = scalar_lea.vmem %s1416_s20, 512 }
  0x63   : > { %1259 = vmatprep.subr.bf16.mxu1 %v1258_v18  ;;  %1250 = vmatprep.subr.bf16.mxu0 %v1487_v0  ;;  %p1419_p3 = scmp.lt.s32.totalorder %s1417_s14, %s1411_s25 }
  0x64   : > { %1194 = vmatmul.mubr.msk.f32.vlgmr.msra.gmra.mrb[0].mxu0 %vm394_vm1, %v387_v3 }
  0x65   : > { %1196 = vmatprep.mubr.msk.f32.mxu0 %vm394_vm1, %v388_v20  ;;  %p1420_p7 = por %p1419_p3, %p1418_p13 }
  0x66   : > { %1261 = vmatpush3.bf16.msra.mxu1 %v1258_v18 }
  0x67   : > { %1265 = vmatprep.subr.bf16.mxu1 %v1487_v0  ;;  %p1421_p9 = pnand %p1420_p7, %p1414_p10 }
  0x68   : > { %1197 = vmatmul.mubr.msk.f32.gmra.mrb[2].mxu0 %vm394_vm1, %v389_v21 }
  0x69   : > { %1222 = vmatmul.mubr.msk.f32.vlgmr.msra.gmra.mrb[2].mxu1 %vm394_vm1, %v1743_v22  ;;  %1210 = vmatprep.mubr.msk.f32.mxu0 %vm1488_vm0, %v1489_v1 }
  0x6a   : > { %1235 = vmatprep.mubr.msk.f32.mxu1 %vm1488_vm0, %v1489_v1  ;;  %1253 = vmatpush3.bf16.xpose.msk.msra.mxu0 %vm1710_vm2, %v1251_v23 }
  0x6b   : > { %1262 = vmatprep.subr.bf16.mxu0 %v1487_v0 }
  0x71   : > { %1211 = vmatmul.mubr.msk.f32.vlgmr.msra.gmra.mrb[4].mxu0 %vm394_vm1, %v492_v17 }
  0x72   : > { %1228 = vmatprep.mubr.msk.f32.mxu0 %vm1488_vm0, %v1489_v1 }
 0x134   : > { %v562_v28 = vpop.f32.mrb[0].mxu1 }
 0x135   : > { %v938_v29 = vrot.slane %v562_v28, %v937_v27  ;;  %v1205_v30 = vpop.f32.mrb[1].mxu1  ;;  %v734_v43 = vrot.slane %v562_v28, %v733_v42 }
 0x137   : > { %v1195_v31 = vpop.f32.mrb[0].mxu0 }
 0x138   : > { %v473_v32 = vpop.f32.mrb[1].mxu0 }
 0x139   : > { %v1263_v33 = vpack.c.bf16 %v1195_v31, %v473_v32 }
 0x13b   : > { %v1198_v36 = vpop.f32.mrb[2].mxu0  ;;  %1264 = vmatpush3.bf16.msra.mxu0 %v1263_v33 }
 0x13c   : > { %v1756_v34 = vpop.f32.mrb[2].mxu1  ;;  %v483_v37 = vpop.f32.mrb[3].mxu0 }
 0x13d   : > { %v1758_v35 = vpop.f32.mrb[3].mxu1  ;;  %v1266_v38 = vpack.c.bf16 %v1198_v36, %v483_v37 }
 0x13e   : > { %723 = vperm.xlu0 %1334, %v1758_v35  }
 0x13f   : > { %1267 = vmatpush3.bf16.msra.mxu1 %v1266_v38 }
 0x142   : > { %728 = vperm.xlu0 %1334, %v1756_v34  }
 0x144   : > { %v632_v39 = vpop.f32.mrb[4].mxu0 }
 0x145   : > { %v942_v40 = vrot.slane %v632_v39, %v937_v27  ;;  %v1212_v41 = vpop.f32.mrb[5].mxu0  ;;  %v738_v47 = vrot.slane %v632_v39, %v733_v42 }
 0x146   : > { %1336 = vset.pattern.permute.xlu0 %v1491_v11 }
 0x1bd   : > { %v724_v44 = vpop.permute.xlu0 %723 }
 0x1be   : > { %v739_v46 = vadd.f32 %v734_v43, %v724_v44 }
 0x1c0   : > { %v755_v48 = vadd.f32 %v1144_v45, %v739_v46 }
 0x1c1   : > { %v729_v49 = vpop.permute.xlu0 %728 }
 0x1c2   : > { %v740_v51 = vadd.f32 %v738_v47, %v729_v49  ;;  %v758_v52 = vsel %vm757_vm3, %v755_v48, -inf }
 0x1c3   : > { %759 = vmax.xlane.f32.xlu1 %v758_v52 }
 0x1c4   : > { %v756_v53 = vadd.f32 %v1145_v50, %v740_v51 }
 0x1c6   : > { %v761_v54 = vsel %vm757_vm3, %v756_v53, -inf }
 0x1c7   : > { %762 = vmax.xlane.f32.xlu1 %v761_v54 }
 0x250   : > { %v760_v55 = vpop.xlane.xlu1 %759 }
 0x251   : > { %v764_v56 = vsub.f32 %v755_v48, %v760_v55 }
 0x253   : > { %v766_v57 = vmul.f32 1.442695, %v764_v56 }
 0x254   : > { %v763_v58 = vpop.xlane.xlu1 %762 }
 0x255   : > { %1337 = vpow2.f32 %v766_v57  ;;  %v765_v59 = vsub.f32 %v756_v53, %v763_v58 }
 0x257   : > { %v768_v60 = vmul.f32 1.442695, %v765_v59 }
 0x259   : > { %1339 = vpow2.f32 %v768_v60 }
 0x25f   : > { %v1338_v61 = vpop.eup %1337 }
 0x260   : > { %v770_v62 = vsel %vm757_vm3, %v1338_v61, 0.0 }
 0x261   : > { %771 = vadd.xlane.f32.xlu0 %v770_v62 }
 0x263   : > { %v1340_v63 = vpop.eup %1339 }
 0x264   : > { %v773_v0 = vsel %vm757_vm3, %v1340_v63, 0.0 }
 0x265   : > { %774 = vadd.xlane.f32.xlu1 %v773_v0 }
 0x2ee   : > { %v772_v1 = vpop.xlane.xlu0 %771 }
 0x2ef   : > { %1341 = vrcp.f32 %v772_v1 }
 0x2f2   : > { %v775_v2 = vpop.xlane.xlu1 %774 }
 0x2f3   : > { %1343 = vrcp.f32 %v775_v2 }
 0x2f9   : > { %v1342_v3 = vpop.eup %1341 }
 0x2fa   : > { %v778_v4 = vmul.f32 %v1342_v3, %v1338_v61 }
 0x2fc   : > { %1229 = vmatmul.mubr.msk.f32.vlgmr.msra.gmra.mrb[6].mxu0 %vm757_vm3, %v778_v4  ;;  %v943_v5 = vmul.f32 %v938_v29, %v778_v4 }
 0x2fd   : > { %v1344_v6 = vpop.eup %1343 }
 0x2fe   : > { %v779_v7 = vmul.f32 %v1344_v6, %v1340_v63  ;;  %v945_v8 = vsel %vm757_vm3, %v943_v5, 0.0 }
 0x2ff   : > { %946 = vadd.xlane.f32.xlu1 %v945_v8 }
 0x300   : > { %1236 = vmatmul.mubr.msk.f32.vlgmr.msra.gmra.mrb[4].mxu1 %vm757_vm3, %v779_v7  ;;  %v944_v9 = vmul.f32 %v942_v40, %v779_v7 }
 0x302   : > { %v948_v10 = vsel %vm757_vm3, %v944_v9, 0.0 }
 0x303   : > { %949 = vadd.xlane.f32.xlu1 %v948_v10 }
 0x38c   : > { %v947_v13 = vpop.xlane.xlu1 %946 }
 0x38d   : > { %v951_v14 = vadd.f32 %v947_v13, %v1758_v35  ;;  %v1146_v35 = vld [vmem:[%s1841_s5] ss:$0 sm:$0xff] }
 0x38f   : > { %v955_v15 = vadd.f32 %v954_v12, %v951_v14 }
 0x390   : > { %v950_v16 = vpop.xlane.xlu1 %949 }
 0x391   : > { %v1149_v17 = vmul.f32 -1.442695, %v955_v15  ;;  %v952_v18 = vadd.f32 %v1756_v34, %v950_v16 }
 0x393   : > { %1345 = vpow2.f32 %v1149_v17  ;;  %v956_v20 = vadd.f32 %v954_v12, %v952_v18 }
 0x395   : > { %v1150_v21 = vmul.f32 -1.442695, %v956_v20 }
 0x397   : > { %1347 = vpow2.f32 %v1150_v21 }
 0x39d   : > { %v1346_v23 = vpop.eup %1345 }
 0x39e   : > { %v963_v24 = vadd.f32 1.0, %v1346_v23 }
 0x3a0   : > { %1349 = vrcp.f32 %v963_v24 }
 0x3a1   : > { %v1348_v25 = vpop.eup %1347 }
 0x3a2   : > { %v964_v26 = vadd.f32 1.0, %v1348_v25 }
 0x3a4   : > { %1351 = vrcp.f32 %v964_v26 }
 0x3aa   : > { %v1350_v27 = vpop.eup %1349 }
 0x3ab   : > { %v981_v28 = vsub.f32 1.0, %v1350_v27 }
 0x3ad   : > { %985 = vperm.xlu0 %1336, %v981_v28  }
 0x3ae   : > { %v1352_v29 = vpop.eup %1351 }
 0x3af   : > { %976 = vperm.xlu1 %1335, %v1352_v29   ;;  %v982_v30 = vsub.f32 1.0, %v1352_v29 }
 0x3b3   : > { %971 = vperm.xlu1 %1335, %v1350_v27  }
 0x3b7   : > { %990 = vperm.xlu1 %1335, %v982_v30  }
 0x3cf   : > { %v856_v31 = vpop.f32.mrb[6].mxu0 }
 0x3d0   : > { %v1230_v32 = vpop.f32.mrb[7].mxu0  ;;  %v857_v36 = vadd.f32 %v1146_v35, %v856_v31 }
 0x3d2   : > { %v933_v40 = vadd.f32 %v857_v36, %v1736_v19 }
 0x3d3   : > { %v929_v33 = vpop.f32.mrb[4].mxu1 }
 0x3d4   : > { %v1237_v34 = vpop.f32.mrb[5].mxu1  ;;  %v930_v39 = vadd.f32 %v1146_v35, %v929_v33 }
 0x3d6   : > { %v934_v44 = vadd.f32 %v930_v39, %v1743_v22 }
 0x42c   : > { %v986_v38 = vpop.permute.xlu0 %985 }
 0x42d   : > { %v993_v42 = vmul.f32 %v986_v38, %v1736_v19 }
 0x42e   : > { %v977_v37 = vpop.permute.xlu1 %976 }
 0x42f   : > { %v980_v47 = vmul.f32 %v977_v37, %v934_v44 }
 0x432   : > { %v972_v41 = vpop.permute.xlu1 %971 }
 0x433   : > { %v979_v43 = vmul.f32 %v972_v41, %v933_v40 }
 0x435   : > { %v995_v45 = vadd.f32 %v993_v42, %v979_v43 }
 0x436   : > { %v991_v46 = vpop.permute.xlu1 %990 }
 0x437   : > { %997 = vst.msk [vmem:[%s370_s16] sm:$0xff] %vm394_vm1, %v995_v45  ;;  %v994_v48 = vmul.f32 %v991_v46, %v1743_v22 }
 0x439   : > { %v996_v19 = vadd.f32 %v994_v48, %v980_v47 }
 0x43b   : > { %998 = vst.msk [vmem:[%s370_s16 + $0x8] sm:$0xff] %vm394_vm1, %v996_v19 }
 0x43c   : > { %1424 = shalt.err (!%p1421_p9)
}
 0x43d   : > { %s1425_s22 = scalar_lea.hbm %s1789_s21, 256  ;;  %s1429_s11 = scalar_lea.hbm %s1844_s8, 512 }
 0x43e   : > { %p1426_p1 = scmp.ne.s32.totalorder %s1789_s21, %s1425_s22  ;;  %p1430_p11 = scmp.lt.u32.totalorder %s1789_s21, %s1844_s8 }
 0x43f   : > { %p1431_p2 = scmp.lt.u32.totalorder %s1429_s11, %s1425_s22  ;;  %p1433_p6 = scmp.lt.u32.totalorder %s1425_s22, %s1789_s21 }
 0x440   : > { %p1427_p0 = pnand %p1426_p1, %p1637_p12 }
 0x441   : > { %p1432_p4 = por %p1431_p2, %p1430_p11 }
 0x442   : > { %p1428_p5 = pneg %p1427_p0 }
 0x443   : > { %p1434_p8 = por %p1433_p6, %p1432_p4 }
 0x445   : > { %p1435_p10 = pnand %p1434_p8, %p1428_p5 }
 0x447   : > { %1438 = shalt.err (!%p1435_p10)
}
 0x448   : > { %s1493_s15 = smov 128   ;;  %s1494_s25 = smov 8  }
 0x449   : > { %1274 = dma.vmem_to_hbm [thread:$0]  (%p1637_p12), %s1791_s17, 256, %s1789_s21, %s1000_s7, %s1493_s15, %s1493_s15, %s1494_s25  }
 0x44a PF: > { %s1028_s19 = sand.u32 1, %s1469_s29   ;;  %p1863_p13 = scmp.ne.s32.totalorder %s1850_s13, 0 }
 0x44b   : > { %p1864_p3 = scmp.ge.s32.totalorder %s1481_s10, 2  ;;  %s1029_s20 = scalar_lea.sflag [#allocation5], %s1028_s19 }
 0x44d   : > { %p1285_p7 = pnand %p1864_p3, %p1863_p13 }
 0x44f   : > { %1464 = dma.done.wait (!%p1285_p7), %s1029_s20, 256  }
 0x450   : > { %1466 = vsyncadd (!%p1285_p7), %s1029_s20, 4294967040  ;;  %p23_p9 = scmp.ge.s32.totalorder %s1599_s18, 4   ;;  %s1865_s29 = smov %s1473_s30 }
 0x451   : > { %s1866_s30 = smov %s1477_s9  ;;  %s1867_s9 = smov %s1633_s23 }
 0x452   : > { %s1868_s10 = smov %s1599_s18  ;;  %25 = sbr.rel (!%p23_p9) target bundleno = 8 (0x8), region = 107 }
 0x459   :  { %1034 = vsyncpa [#allocation4], 1 }
 0x45a   :  { %1036 = vsyncpa [#allocation4 + $0x1], 1 }
 0x45b   :  { %1037 = vsyncpa [#allocation7], 1 }
 0x45c   :  { %1038 = vsyncpa [#allocation5], 1 }
 0x45d   :  { %1040 = vsyncpa [#allocation5 + $0x1], 1 }

</bundles_post_ra>
